<compile_context>
chip_gen: v7x
topology: tpu7x:2x2x1
jax: 0.10.0
libtpu: 0.0.40
codegen_flags: <defaults>
</compile_context>

<pallas_src>
import functools
from typing import NamedTuple

import jax
import jax.numpy as jnp
from jax.experimental import pallas as pl
from jax.experimental.pallas import tpu as pltpu

_LANE = 128
_SUBLANE = 8


def _round_up(x, m):
    return (x + m - 1) // m * m


class PolicyFCMeta(NamedTuple):
    len_obs: int
    len_hidden: int
    len_act: int
    r_b1: int      # slab row holding the layer-1 bias
    r_w2: int      # first slab row of w2^T
    r_b2: int      # slab row holding the layer-2 bias
    hid_rows: int  # round_up(len_hidden, 8): row extent of the w2^T block
    lanes: int     # lane (column) width of the slab (>= 128)
    rows: int      # total slab rows (multiple of 8)


def prepare_policy_fc_params(w1, b1, w2, b2, param_dtype=jnp.bfloat16):
    """One-time parameter prep (do NOT call per forward pass).

    w1: (len_hidden, len_obs)  b1: (len_hidden,)   -- PyTorch (out, in) layout
    w2: (len_act, len_hidden)  b2: (len_act,)

    Returns (slab, meta): a single zero-padded (rows, lanes) array holding
      rows [0, len_obs)             : w1^T (len_obs, len_hidden), lane-padded
      row  r_b1                     : b1
      rows [r_w2, r_w2 + hid_rows)  : w2^T (len_hidden, len_act), padded
      row  r_b2                     : b2
    All row segments start on 8-row (sublane) boundaries.
    """
    len_hidden, len_obs = w1.shape
    len_act = w2.shape[0]

    lanes = max(_round_up(len_hidden, _LANE), _round_up(len_act, _LANE))
    hid_rows = _round_up(len_hidden, _SUBLANE)
    r_b1 = _round_up(len_obs, _SUBLANE)
    r_w2 = r_b1 + _SUBLANE
    r_b2 = r_w2 + hid_rows
    rows = r_b2 + _SUBLANE

    slab = jnp.zeros((rows, lanes), jnp.float32)
    slab = slab.at[:len_obs, :len_hidden].set(jnp.asarray(w1, jnp.float32).T)
    slab = slab.at[r_b1, :len_hidden].set(jnp.asarray(b1, jnp.float32))
    slab = slab.at[r_w2:r_w2 + len_hidden, :len_act].set(
        jnp.asarray(w2, jnp.float32).T)
    slab = slab.at[r_b2, :len_act].set(jnp.asarray(b2, jnp.float32))
    slab = slab.astype(param_dtype)

    meta = PolicyFCMeta(len_obs, len_hidden, len_act,
                        r_b1, r_w2, r_b2, hid_rows, lanes, rows)
    return slab, meta


def _policy_fc_kernel(x_ref, p_ref, q_ref, act_ref, *, meta: PolicyFCMeta):
    # Static, sublane-aligned slices of the single parameter slab.
    w1 = p_ref[0:meta.len_obs, :]                        # (len_obs, lanes)
    b1 = p_ref[meta.r_b1:meta.r_b1 + 1, :]               # (1, lanes)
    w2 = p_ref[meta.r_w2:meta.r_w2 + meta.hid_rows, :]   # (hid_rows, lanes)
    b2 = p_ref[meta.r_b2:meta.r_b2 + 1, :]               # (1, lanes)

    # Layer 1: (1, len_obs) @ (len_obs, lanes) on the MXU, f32 accumulate.
    # NOTE: with bf16 params the observation is also truncated to bf16 here;
    # acceptable input-precision loss for this policy net.
    x = x_ref[...].astype(w1.dtype)
    h = jnp.dot(x, w1, preferred_element_type=jnp.float32)
    h = jnp.tanh(h + b1.astype(jnp.float32))             # f32 elementwise

    # Layer 2: only the first hid_rows lanes of h carry data (padded hidden
    # lanes are tanh(0)=0); contract against the hid_rows-row w2^T block.
    hk = h[:, :meta.hid_rows].astype(w2.dtype)           # (1, hid_rows)
    q = jnp.dot(hk, w2, preferred_element_type=jnp.float32)
    q = q + b2.astype(jnp.float32)                       # (1, lanes) f32

    # Q-values: store exactly (1, len_act), no follow-on slice HLO needed.
    q_ref[...] = q[:, :meta.len_act].astype(q_ref.dtype)

    # Fused greedy action selection (padded lanes masked to -inf so a padded
    # 0.0 can never beat a negative Q-value).
    lane = jax.lax.broadcasted_iota(jnp.int32, (1, meta.lanes), 1)
    valid = lane < meta.len_act
    q_m = jnp.where(valid, q, -jnp.inf)
    q_max = jnp.max(q_m)
    idx = jnp.min(jnp.where((q_m == q_max) & valid, lane, meta.lanes))
    act_ref[0, 0] = idx.astype(jnp.int32)


@functools.partial(jax.jit, static_argnames=("meta",))
def policy_fc_forward_and_act(obs, slab, meta: PolicyFCMeta):
    """obs (any shape with len_obs elems) -> (Q (1, len_act) f32, action (1,1) i32)."""
    x = obs.reshape(1, -1).astype(jnp.float32)           # metadata-only reshape
    itemsize = jnp.dtype(slab.dtype).itemsize
    kernel = functools.partial(_policy_fc_kernel, meta=meta)

    q, act = pl.pallas_call(
        kernel,
        out_shape=(
            jax.ShapeDtypeStruct((1, meta.len_act), jnp.float32),
            jax.ShapeDtypeStruct((1, 1), jnp.int32),
        ),
        grid=(),                                          # single grid point
        in_specs=[
            pl.BlockSpec((1, meta.len_obs), lambda: (0, 0)),
            pl.BlockSpec((meta.rows, meta.lanes), lambda: (0, 0)),
        ],
        out_specs=(
            pl.BlockSpec((1, meta.len_act), lambda: (0, 0)),
            pl.BlockSpec(memory_space=pltpu.MemorySpace.SMEM),
        ),
        cost_estimate=pl.CostEstimate(
            flops=2 * (meta.len_obs * meta.len_hidden
                       + meta.len_hidden * meta.len_act),
            transcendentals=meta.len_hidden,
            bytes_accessed=int(meta.len_obs * 4
                               + meta.rows * meta.lanes * itemsize
                               + meta.len_act * 4 + 4),
        ),
    )(x, slab)
    return q, act


def policy_fc_forward(obs, slab, meta: PolicyFCMeta):
    """PolicyFC.forward semantics: Q-values of shape (1, len_act)."""
    q, _ = policy_fc_forward_and_act(obs, slab, meta)
    return q


def init_policy_fc_params(key, len_obs, len_act, len_hidden):
    """Deterministic init matching nn.Linear default (U(-1/sqrt(fan_in), +))."""
    k1, k2, k3, k4 = jax.random.split(key, 4)
    bound1 = 1.0 / (len_obs ** 0.5)
    bound2 = 1.0 / (len_hidden ** 0.5)
    w1 = jax.random.uniform(k1, (len_hidden, len_obs), jnp.float32,
                            minval=-bound1, maxval=bound1)
    b1 = jax.random.uniform(k2, (len_hidden,), jnp.float32,
                            minval=-bound1, maxval=bound1)
    w2 = jax.random.uniform(k3, (len_act, len_hidden), jnp.float32,
                            minval=-bound2, maxval=bound2)
    b2 = jax.random.uniform(k4, (len_act,), jnp.float32,
                            minval=-bound2, maxval=bound2)
    return w1, b1, w2, b2


if __name__ == "__main__":
    len_obs, len_act, len_hidden = 32, 8, 32

    key = jax.random.PRNGKey(0)
    k_params, k_obs = jax.random.split(key)
    w1, b1, w2, b2 = init_policy_fc_params(k_params, len_obs, len_act, len_hidden)
    obs = jax.random.normal(k_obs, (len_obs,), jnp.float32)

    # Pure-JAX f32 reference of the PyTorch math.
    ref = jnp.tanh(obs.reshape(1, -1) @ w1.T + b1) @ w2.T + b2

    # Default path: bf16 weights (MXU-native on v5e/v6e/v7x), f32 accumulate.
    slab_bf16, meta = prepare_policy_fc_params(w1, b1, w2, b2)
    q_bf16, act = policy_fc_forward_and_act(obs, slab_bf16, meta)
    jax.block_until_ready((q_bf16, act))
    assert q_bf16.shape == (1, len_act)
    assert act.shape == (1, 1)
    assert jnp.allclose(q_bf16, ref, atol=3e-2, rtol=3e-2)
    assert int(act[0, 0]) == int(jnp.argmax(q_bf16[0]))

    # f32-parameter path: bit-tight parity with the f32 reference.
    slab_f32, meta_f32 = prepare_policy_fc_params(
        w1, b1, w2, b2, param_dtype=jnp.float32)
    q_f32 = policy_fc_forward(obs, slab_f32, meta_f32)
    jax.block_until_ready(q_f32)
    assert q_f32.shape == (1, len_act)
    assert jnp.allclose(q_f32, ref, atol=1e-5, rtol=1e-5)

    print("KERNEL_OK")
</pallas_src>

<mosaic_0001>
module attributes {stable_mosaic.version = 11 : i64} {
  func.func @_policy_fc_kernel(%arg0: memref<1x32xf32, #tpu.memory_space<vmem>>, %arg1: memref<80x128xbf16, #tpu.memory_space<vmem>>, %arg2: memref<1x8xf32, #tpu.memory_space<vmem>>, %arg3: memref<1x1xi32, #tpu.memory_space<smem>>) attributes {dimension_semantics = [], scalar_prefetch = 0 : i64, scratch_operands = 0 : i64, tpu.core_type = #tpu.core_type<tc>} {
    %c0 = arith.constant 0 : index
    %c0_0 = arith.constant 0 : index
    %0 = vector.load %arg1[%c0, %c0_0] : memref<80x128xbf16, #tpu.memory_space<vmem>>, vector<32x128xbf16>
    %c32 = arith.constant 32 : index
    %c0_1 = arith.constant 0 : index
    %1 = vector.load %arg1[%c32, %c0_1] : memref<80x128xbf16, #tpu.memory_space<vmem>>, vector<1x128xbf16>
    %c40 = arith.constant 40 : index
    %c0_2 = arith.constant 0 : index
    %2 = vector.load %arg1[%c40, %c0_2] : memref<80x128xbf16, #tpu.memory_space<vmem>>, vector<32x128xbf16>
    %c72 = arith.constant 72 : index
    %c0_3 = arith.constant 0 : index
    %3 = vector.load %arg1[%c72, %c0_3] : memref<80x128xbf16, #tpu.memory_space<vmem>>, vector<1x128xbf16>
    %c0_4 = arith.constant 0 : index
    %c0_5 = arith.constant 0 : index
    %4 = vector.load %arg0[%c0_4, %c0_5] : memref<1x32xf32, #tpu.memory_space<vmem>>, vector<1x32xf32>
    %5 = arith.truncf %4 : vector<1x32xf32> to vector<1x32xbf16>
    %cst = arith.constant dense<0.000000e+00> : vector<1x128xf32>
    %6 = tpu.matmul %5, %0, %cst {dimension_numbers = #tpu.dot_dimension_numbers<[1], [0], [0], [1], [0, 0, 1, 1], [], []>} : vector<1x32xbf16>, vector<32x128xbf16>, vector<1x128xf32> -> vector<1x128xf32>
    %7 = arith.extf %1 : vector<1x128xbf16> to vector<1x128xf32>
    %8 = arith.addf %6, %7 : vector<1x128xf32>
    %9 = math.tanh %8 : vector<1x128xf32>
    %10 = vector.extract_strided_slice %9 {offsets = [0, 0], sizes = [1, 32], strides = [1, 1]} : vector<1x128xf32> to vector<1x32xf32>
    %11 = arith.truncf %10 : vector<1x32xf32> to vector<1x32xbf16>
    %cst_6 = arith.constant dense<0.000000e+00> : vector<1x128xf32>
    %12 = tpu.matmul %11, %2, %cst_6 {dimension_numbers = #tpu.dot_dimension_numbers<[1], [0], [0], [1], [0, 0, 1, 1], [], []>} : vector<1x32xbf16>, vector<32x128xbf16>, vector<1x128xf32> -> vector<1x128xf32>
    %13 = arith.extf %3 : vector<1x128xbf16> to vector<1x128xf32>
    %14 = arith.addf %12, %13 : vector<1x128xf32>
    %15 = vector.extract_strided_slice %14 {offsets = [0, 0], sizes = [1, 8], strides = [1, 1]} : vector<1x128xf32> to vector<1x8xf32>
    %c0_7 = arith.constant 0 : index
    %c0_8 = arith.constant 0 : index
    %16 = vector.load %arg2[%c0_7, %c0_8] : memref<1x8xf32, #tpu.memory_space<vmem>>, vector<1x8xf32>
    tpu.vector_store %arg2[%c0_7, %c0_8], %15 {strides = array<i32>} : memref<1x8xf32, #tpu.memory_space<vmem>>, vector<1x8xf32>,
    %17 = tpu.iota {dimensions = array<i32: 1>} : vector<1x128xi32>
    %c8_i32 = arith.constant 8 : i32
    %18 = vector.broadcast %c8_i32 : i32 to vector<1x128xi32>
    %19 = arith.cmpi slt, %17, %18 : vector<1x128xi32>
    %cst_9 = arith.constant 0xFF800000 : f32
    %20 = vector.broadcast %cst_9 : f32 to vector<1x128xf32>
    %21 = arith.select %19, %14, %20 : vector<1x128xi1>, vector<1x128xf32>
    %22 = vector.shape_cast %21 : vector<1x128xf32> to vector<1x1x128xf32>
    %cst_10 = arith.constant dense<0xFF800000> : vector<1xf32>
    %23 = vector.multi_reduction <maximumf>, %22, %cst_10 [1, 2] : vector<1x1x128xf32> to vector<1xf32>
    %24 = vector.shape_cast %23 : vector<1xf32> to vector<1x1x1xf32>
    %25 = vector.extract %24[0, 0, 0] : f32 from vector<1x1x1xf32>
    %26 = vector.broadcast %25 : f32 to vector<1x128xf32>
    %27 = arith.cmpf oeq, %21, %26 : vector<1x128xf32>
    %28 = arith.andi %27, %19 : vector<1x128xi1>
    %c128_i32 = arith.constant 128 : i32
    %29 = vector.broadcast %c128_i32 : i32 to vector<1x128xi32>
    %30 = arith.select %28, %17, %29 : vector<1x128xi1>, vector<1x128xi32>
    %31 = vector.shape_cast %30 : vector<1x128xi32> to vector<1x1x128xi32>
    %cst_11 = arith.constant dense<2147483647> : vector<1xi32>
    %32 = vector.multi_reduction <minsi>, %31, %cst_11 [1, 2] : vector<1x1x128xi32> to vector<1xi32>
    %33 = vector.shape_cast %32 : vector<1xi32> to vector<1x1x1xi32>
    %34 = vector.extract %33[0, 0, 0] : i32 from vector<1x1x1xi32>
    %c0_12 = arith.constant 0 : index
    %c0_13 = arith.constant 0 : index
    %35 = memref.load %arg3[%c0_12, %c0_13] : memref<1x1xi32, #tpu.memory_space<smem>>
    memref.store %34, %arg3[%c0_12, %c0_13] : memref<1x1xi32, #tpu.memory_space<smem>>
    return
  }
}

</mosaic_0001>

<bundles_post_ra>
// kernel: policy_fc_forward_and_act.1
= control target key start
LH: loop header
LB: loop body
LE: loop exit
PB: predicated region body
PF: predicated region fallthrough
CT: control target
= control target key end

     0   :  { %9 = vsyncpa [#allocation3], 0  ;;  %s410_s0 = inlined_call_operand.vmem [shape: f32[1,32], index: 0, kind: input, shape index: {}]   ;;  %s411_s1 = inlined_call_operand.hbm [shape: bf16[80,128], index: 1, kind: input, shape index: {}]   ;;  %s412_s2 = inlined_call_operand.hbm [shape: f32[1,8], index: 2, kind: output, shape index: {0}]   ;;  %s413_s3 = inlined_call_operand.hbm [shape: s32[1,1], index: 3, kind: output, shape index: {1}]  }
   0x1   :  { %10 = vsyncpa [#allocation4], 0 }
   0x2   :  { %11 = vsyncpa [#allocation5], 0  ;;  %s338_s12 = smov [#allocation2]   ;;  %s278_s16 = scalar_lea.hbm %s411_s1, 640 }
   0x3   :  { %s19_s13 = sshll.u32 %s338_s12, 4  ;;  %p279_p0 = scmp.ne.s32.totalorder %s411_s1, %s278_s16  ;;  %s20_s13 = int_to_ptr.vmem [resolvable:$true] %s19_s13 }
   0x4   :  { %p282_p1 = scmp.lt.u32.totalorder %s278_s16, %s411_s1 }
   0x6   :  { %p284_p2 = pnand %p282_p1, %p279_p0 }
   0x8   :  { %287 = shalt.err (!%p284_p2)
}
   0x9   :  { %s288_s21 = scalar_lea.vmem %s20_s13, 640  ;;  %p293_p4 = scmp.lt.s32.totalorder %s20_s13, %s20_s13 }
   0xa   :  { %p289_p3 = scmp.ne.s32.totalorder %s20_s13, %s288_s21  ;;  %p294_p5 = scmp.lt.s32.totalorder %s288_s21, %s288_s21 }
   0xc   :  { %p295_p6 = por %p294_p5, %p293_p4 }
   0xe   :  { %p296_p7 = pnand %p295_p6, %p289_p3 }
  0x10   :  { %299 = shalt.err (!%p296_p7)
}
  0x11   :  { %s339_s22 = smov 64   ;;  %s340_s23 = smov 4  }
  0x12   :  { %25 = dma.hbm_to_vmem [thread:$0]  %s411_s1, 640, %s20_s13, [#allocation3], %s339_s22, %s339_s22, %s340_s23  }
  0x13   :  { %332 = dma.done.wait [#allocation3], 640  }
  0x14   :  { %333 = vsyncadd [#allocation3], 4294966656  ;;  %v341_v0 = vmov 0.0   ;;  %vm342_vm0 = vmmov 0   ;;  %v272_v1 = vld [vmem:[#allocation2] sm:$0xff]   ;;  %v273_v2 = vld [vmem:[#allocation2 + $0x8] sm:$0xff]   ;;  %v159_v16 = vlaneseq }
  0x15   :  { %245 = vmatprep.subr.bf16.mxu0 %v341_v0  ;;  %249 = vmatprep.mubr.msk.bf16.mxu0 %vm342_vm0, %v341_v0  ;;  %v40_v3 = vld [vmem:[%s410_s0] sm:$0x1]  ;;  %vm55_vm1 = vcmask 261120   ;;  %v274_v5 = vld [vmem:[#allocation2 + $0x14] sm:$0xff]   ;;  %v34_v7 = vld [vmem:[#allocation2 + $0x10] sm:$0x1] }
  0x16   :  { %253 = vmatprep.subr.bf16.mxu1 %v341_v0  ;;  %257 = vmatprep.mubr.msk.bf16.mxu1 %vm342_vm0, %v341_v0  ;;  %v41_v4 = vpack.c.bf16 %v40_v3, %v40_v3  ;;  %v275_v6 = vld [vmem:[#allocation2 + $0x1c] sm:$0xff]   ;;  %v42_v8 = vunpack.c.l.bf16 %v34_v7  ;;  %v39_v17 = vld [vmem:[#allocation2 + $0x24] sm:$0x1]  ;;  %v160_v18 = vand.u32 127, %v159_v16  ;;  %vm157_vm3 = vcmask 57344   ;;  %s343_s1 = smov [#allocation6]  }
  0x17   :  { %246 = vmatpush3.bf16.msra.mxu0 %v272_v1  ;;  %254 = vmatpush3.bf16.msra.mxu1 %v274_v5  ;;  %v101_v19 = vunpack.c.l.bf16 %v39_v17  ;;  %vm163_vm4 = vcmask 1040384   ;;  %s211_s28 = sshll.u32 %s343_s1, 4  ;;  %s212_s28 = int_to_ptr.vmem [resolvable:$true] %s211_s28 }
  0x18   :  { %247 = vmatprep.subr.bf16.mxu0 %v341_v0  ;;  %255 = vmatprep.subr.bf16.mxu1 %v341_v0  ;;  %vm161_vm2 = vcmp.lt.s32.totalorder %v160_v18, 8  ;;  %s300_s29 = scalar_lea.vmem %s212_s28, 16  ;;  %s304_s30 = scalar_lea.vmem %s212_s28, 32 }
  0x19   :  { %p301_p8 = scmp.ne.s32.totalorder %s212_s28, %s300_s29  ;;  %p305_p9 = scmp.lt.s32.totalorder %s212_s28, %s212_s28 }
  0x1a   :  { %p306_p10 = scmp.lt.s32.totalorder %s304_s30, %s300_s29 }
  0x1b   :  { %248 = vmatpush3.bf16.msra.mxu0 %v273_v2  ;;  %256 = vmatpush3.bf16.msra.mxu1 %v275_v6 }
  0x1c   :  { %p307_p11 = por %p306_p10, %p305_p9 }
  0x1e   :  { %250 = vmatmul.mubr.msk.bf16.vlgmr.msra.gmra.mrb[0].mxu0 %vm55_vm1, %v41_v4  ;;  %p308_p12 = pnand %p307_p11, %p301_p8 }
  0xf1   :  { %v93_v9 = vpop.f32.mrb[0].mxu0 }
  0xf2   :  { %v94_v10 = vadd.f32 %v93_v9, %v42_v8  ;;  %v251_v11 = vpop.f32.mrb[1].mxu0 }
  0xf3   :  { %v96_v12 = vpop.f32.mrb[2].mxu0 }
  0xf4   :  { %276 = vtanh.f32 %v94_v10  ;;  %v252_v13 = vpop.f32.mrb[3].mxu0 }
  0xfe   :  { %v277_v14 = vpop.eup %276 }
  0xff   :  { %v100_v15 = vpack.c.bf16 %v277_v14, %v277_v14 }
 0x101   :  { %258 = vmatmul.mubr.msk.bf16.vlgmr.msra.gmra.mrb[0].mxu1 %vm55_vm1, %v100_v15 }
 0x1d4   :  { %v151_v20 = vpop.f32.mrb[0].mxu1 }
 0x1d5   :  { %v152_v21 = vadd.f32 %v151_v20, %v101_v19  ;;  %v259_v22 = vpop.f32.mrb[1].mxu1 }
 0x1d6   :  { %v154_v23 = vpop.f32.mrb[2].mxu1 }
 0x1d7   :  { %v260_v24 = vpop.f32.mrb[3].mxu1  ;;  %v162_v25 = vsel %vm161_vm2, %v152_v21, -inf  ;;  %158 = vst.msk [vmem:[#allocation6] sm:$0x1] %vm157_vm3, %v152_v21 }
 0x1d8   :  { %v164_v26 = vsel %vm163_vm4, %v162_v25, -inf }
 0x1d9   :  { %165 = vmax.xlane.f32.xlu0 %v164_v26 }
 0x266   :  { %v166_v27 = vpop.xlane.xlu0 %165 }
 0x267   :  { %v167_v28 = vrot.slane %v166_v27, 4 }
 0x269   :  { %v168_v29 = vmax.f32 %v166_v27, %v167_v28 }
 0x26b   :  { %v169_v30 = vrot.slane %v168_v29, 2 }
 0x26d   :  { %v170_v31 = vmax.f32 %v168_v29, %v169_v30 }
 0x26f   :  { %v171_v32 = vrot.slane %v170_v31, 1 }
 0x271   :  { %v172_v33 = vmax.f32 %v170_v31, %v171_v32 }
 0x273   :  { %261 = vpush %v172_v33 }
 0x2a4   :  { %s262_s0 = spop %261 }
 0x2a5   :  { %v174_v34 = vstv %s262_s0 }
 0x2a6   :  { %vm175_vm5 = vcmp.eq.f32.partialorder %v162_v25, %v174_v34 }
 0x2a7   :  { %vm176_vm6 = vmand %vm175_vm5, %vm161_vm2 }
 0x2a8   :  { %v177_v35 = vsel %vm176_vm6, %v160_v18, 128 }
 0x2a9   :  { %v178_v36 = vsel %vm163_vm4, %v177_v35, 2147483647 }
 0x2aa   :  { %v180_v37 = vshra.s32 %v178_v36, 16  ;;  %v179_v39 = vand.u32 65535, %v178_v36 }
 0x2ac   :  { %v182_v38 = vcvt.s32.f32 %v180_v37  ;;  %v181_v41 = vcvt.s32.f32 %v179_v39 }
 0x2ae   :  { %183 = vmin.xlane.f32.xlu0 %v182_v38 }
 0x33b   :  { %v184_v40 = vpop.xlane.xlu0 %183 }
 0x33c   :  { %vm185_vm7 = vcmp.eq.f32.partialorder %v182_v38, %v184_v40 }
 0x33d   :  { %v186_v42 = vsel %vm185_vm7, %v181_v41, inf }
 0x33e   :  { %187 = vmin.xlane.f32.xlu1 %v186_v42 }
 0x33f   :  { %311 = shalt.err (!%p308_p12)
}
 0x340   :  { %s312_s6 = scalar_lea.hbm %s412_s2, 16 }
 0x341   :  { %p313_p13 = scmp.ne.s32.totalorder %s412_s2, %s312_s6  ;;  %p316_p0 = scmp.lt.u32.totalorder %s312_s6, %s412_s2 }
 0x343   :  { %p318_p1 = pnand %p316_p0, %p313_p13 }
 0x345   :  { %321 = shalt.err (!%p318_p1)
}
 0x346   :  { %214 = dma.vmem_to_hbm [thread:$0]  %s212_s28, 16, %s412_s2, [#allocation4]   ;;  %v190_v43 = vcvt.f32.s32 %v184_v40 }
 0x347   :  { %s322_s2 = scalar_lea.hbm %s413_s3, 16 }
 0x348   :  { %v191_v45 = vshll.u32 %v190_v43, 16  ;;  %p323_p2 = scmp.ne.s32.totalorder %s413_s3, %s322_s2  ;;  %p326_p3 = scmp.lt.u32.totalorder %s322_s2, %s413_s3 }
 0x34a   :  { %p328_p4 = pnand %p326_p3, %p323_p2 }
 0x3cb   :  { %v188_v44 = vpop.xlane.xlu1 %187 }
 0x3cc   :  { %v189_v46 = vcvt.f32.s32 %v188_v44 }
 0x3ce   :  { %v192_v47 = vadd.s32 %v191_v45, %v189_v46 }
 0x3d0   :  { %v193_v48 = vrot.slane %v192_v47, 4 }
 0x3d2   :  { %vm194_vm8 = vcmp.lt.s32.totalorder %v192_v47, %v193_v48 }
 0x3d3   :  { %v195_v49 = vsel %vm194_vm8, %v192_v47, %v193_v48 }
 0x3d4   :  { %v196_v50 = vrot.slane %v195_v49, 2 }
 0x3d6   :  { %vm197_vm9 = vcmp.lt.s32.totalorder %v195_v49, %v196_v50 }
 0x3d7   :  { %v198_v51 = vsel %vm197_vm9, %v195_v49, %v196_v50 }
 0x3d8   :  { %v199_v52 = vrot.slane %v198_v51, 1 }
 0x3da   :  { %vm200_vm10 = vcmp.lt.s32.totalorder %v198_v51, %v199_v52 }
 0x3db   :  { %v201_v53 = vsel %vm200_vm10, %v198_v51, %v199_v52 }
 0x3dc   :  { %263 = vpush %v201_v53 }
 0x40d   :  { %s264_s13 = spop %263 }
 0x40e   :  { %204 = sst [smem:[#allocation7]] %s264_s13 }
 0x40f   :  { %331 = shalt.err (!%p328_p4)
}
 0x410   :  { %s344_s20 = smov [#allocation7]  }
 0x411   :  { %222 = dma.smem_to_hbm %s344_s20, 16, %s413_s3, [#allocation5]  }
 0x412   :  { %334 = dma.done.wait [#allocation4], 16  }
 0x413   :  { %335 = vsyncadd [#allocation4], 4294967280 }
 0x414   :  { %336 = dma.done.wait [#allocation5], 16  }
 0x415   :  { %337 = vsyncadd [#allocation5], 4294967280 }
 0x416   :  { %229 = sfence }
 0x417   :  { %230 = vsyncpa [#allocation3], 1 }
 0x418   :  { %231 = vsyncpa [#allocation4], 1 }
 0x419   :  { %232 = vsyncpa [#allocation5], 1 }

</bundles_post_ra>
